<compile_context>
chip_gen: v6e
topology: v6e:2x2x1
jax: 0.10.0
libtpu: 0.0.40
codegen_flags: <defaults>
</compile_context>

<pallas_src>
import functools

import jax
import jax.numpy as jnp
import numpy as np
from jax.experimental import pallas as pl
from jax.experimental.pallas import tpu as pltpu

H = W = 7
HW = H * W            # 49
HW_PAD = 56           # 49 padded to a sublane multiple (in VMEM only)
LN_EPS = 1e-5


def _concat_block_kernel(x_ref, y_ref, wt_ref, b_ref, g_ref, bt_ref, o_ref,
                         r_scr):
    """One grid step = TB samples, NCHW in / NCHW out.

    x_ref : (TB, Cx, 49)   y_ref : (TB, Cy, 49)        (NCHW, spatial flat)
    wt_ref: (C, C)   fused (dw ∘ pointwise) weight, pre-transposed (Cin, Cout)
    b_ref : (1, C)   fused bias (f32)
    g_ref / bt_ref: (49, C)   LayerNorm affine, channels-last (f32)
    o_ref : (TB, C, 49)     (NCHW out)
    r_scr : VMEM (TB, 56, C) channels-last staging slab (model dtype)
    """
    tb, c, _ = o_ref.shape
    cx = x_ref.shape[1]

    # ---- build the channels-last activation slab in VMEM -------------------
    # Channel concat never touches HBM; spatial rows 49..55 are zero padding so
    # the flatten below is a sublane-aligned (free) relabel of the layout.
    r_scr[:, HW:, :] = jnp.zeros((tb, HW_PAD - HW, c), r_scr.dtype)
    r_scr[:, :HW, :cx] = jnp.transpose(x_ref[...], (0, 2, 1))   # (TB, 49, Cx)
    r_scr[:, :HW, cx:] = jnp.transpose(y_ref[...], (0, 2, 1))   # (TB, 49, Cy)

    # ---- fused depthwise + pointwise 1x1 conv: one lane-dense matmul -------
    # M = TB*56 (good MXU row fill), K = C (full), N = C (lane axis).
    rr = r_scr[...].reshape(tb * HW_PAD, c)
    prec = (jax.lax.Precision.HIGHEST if rr.dtype == jnp.float32
            else jax.lax.Precision.DEFAULT)
    p = jnp.dot(rr, wt_ref[...], precision=prec,
                preferred_element_type=jnp.float32)              # (TB*56, C) f32
    # Drop the spatial pad rows immediately; add the fused bias.
    p = p.reshape(tb, HW_PAD, c)[:, :HW, :] + b_ref[...]         # (TB, 49, C)

    # ---- LayerNorm over (C, 7, 7) per sample, two-pass, vectorized over TB --
    inv_n = 1.0 / float(HW * c)
    mean = jnp.sum(jnp.sum(p, axis=2, keepdims=True),
                   axis=1, keepdims=True) * inv_n                # (TB, 1, 1)
    d = p - mean
    var = jnp.sum(jnp.sum(d * d, axis=2, keepdims=True),
                  axis=1, keepdims=True) * inv_n
    inv_std = jax.lax.rsqrt(var + LN_EPS)
    out_cl = d * inv_std * g_ref[...] + bt_ref[...]              # (TB, 49, C)

    # ---- channels-last -> NCHW for the store (HBM I/O stays NCHW) ----------
    o_ref[...] = jnp.transpose(out_cl.astype(o_ref.dtype), (0, 2, 1))


def _fold_params(params, act_dtype):
    """Fold the depthwise 1x1 conv into the pointwise conv (exact algebra):
        point(dw(r)) = (W_pc diag(w_dw)) r + (W_pc b_dw + b_pc)
    and pre-transpose everything for the channels-last in-kernel matmul."""
    w_dw = params["w_dw"].reshape(-1)                    # (C,)
    b_dw = params["b_dw"].reshape(-1)                    # (C,)
    w_pc = params["w_pc"]                                # (C_out, C_in)
    b_pc = params["b_pc"].reshape(-1)                    # (C,)

    w_fused = w_pc * w_dw[None, :]                       # scale input columns
    b_fused = jnp.dot(w_pc, b_dw,
                      precision=jax.lax.Precision.HIGHEST) + b_pc

    wt = w_fused.T.astype(act_dtype)                     # (C_in, C_out)
    b_row = b_fused.reshape(1, -1).astype(jnp.float32)   # (1, C)
    gamma_t = params["gamma"].T.astype(jnp.float32)      # (49, C)
    beta_t = params["beta"].T.astype(jnp.float32)        # (49, C)
    return wt, b_row, gamma_t, beta_t


def _vmem_budget_bytes():
    """Working-set budget for the activation slabs, derived from the actual
    generation (v5e/v6e: 128 MiB physical, v7x: 64 MiB physical per TC)."""
    try:
        cap = int(pltpu.get_tpu_info().vmem_capacity_bytes)
    except Exception:                       # pragma: no cover - defensive
        cap = 64 * 1024 * 1024
    return min(32 * 1024 * 1024, cap // 2)


def _pick_tb(n, cx, cy, act_itemsize, budget):
    """Samples per grid step.

    Big enough to amortize the ~0.35us/step pipeline overhead and fill the HBM
    pipeline, small enough that double-buffered I/O + the channels-last scratch
    + f32 temporaries stay inside the VMEM budget.  Prefers a divisor of n (no
    HBM batch-pad copy) and keeps >= 2 grid steps so the "parallel" batch axis
    can shard across v7x's two TensorCores.
    """
    c = cx + cy
    const_bytes = (c * c + c + 2 * HW * c) * 4            # single-buffered
    per_sample = (2 * (cx + cy + c) * HW * act_itemsize    # dbl-buffered in/out
                  + HW_PAD * c * act_itemsize              # scratch slab
                  + 6 * HW_PAD * c * 4)                    # f32 temporaries
    usable = max(budget - const_bytes - (2 << 20), per_sample)
    cap = max(1, int(usable * 0.6) // per_sample)
    if n >= 2:
        cap = min(cap, (n + 1) // 2)       # >= 2 grid steps (v7x megacore)
    cap = min(cap, n)
    tb = 1
    for t in range(cap, 0, -1):            # prefer a divisor of n
        if n % t == 0:
            tb = t
            break
    if 4 * tb < cap:                       # only tiny divisors: accept a pad
        tb = cap
    return tb


@functools.partial(jax.jit, static_argnames=("block_b",))
def concat_block_forward(x, y, params, block_b=None):
    """x: (N, Cx, 7, 7), y: (N, Cy, 7, 7)  ->  (N, Cx+Cy, 7, 7)  (all NCHW)."""
    n, cx = x.shape[0], x.shape[1]
    cy = y.shape[1]
    c = cx + cy
    assert x.shape[2:] == (H, W) and y.shape[2:] == (H, W)
    y = y.astype(x.dtype)

    # Free reshapes only (merge trailing spatial dims); activations stay NCHW
    # in HBM — no wrapper transposes / layout round-trips.
    x3 = x.reshape(n, cx, HW)
    y3 = y.reshape(n, cy, HW)

    wt, b_row, gamma_t, beta_t = _fold_params(params, x.dtype)

    budget = _vmem_budget_bytes()
    tb = (block_b if block_b is not None
          else _pick_tb(n, cx, cy, jnp.dtype(x.dtype).itemsize, budget))
    n_blocks = pl.cdiv(n, tb)
    n_pad = n_blocks * tb
    if n_pad != n:   # rare: only when no reasonable divisor of n exists
        x3 = jnp.pad(x3, ((0, n_pad - n), (0, 0), (0, 0)))
        y3 = jnp.pad(y3, ((0, n_pad - n), (0, 0), (0, 0)))

    # Constant-index operands never change across the grid: single-buffer them.
    def const_spec(shape):
        return pl.BlockSpec(shape, lambda i: (0, 0),
                            pipeline_mode=pl.Buffered(1))

    out = pl.pallas_call(
        _concat_block_kernel,
        out_shape=jax.ShapeDtypeStruct((n_pad, c, HW), x.dtype),
        grid_spec=pltpu.PrefetchScalarGridSpec(
            num_scalar_prefetch=0,
            grid=(n_blocks,),
            in_specs=[
                pl.BlockSpec((tb, cx, HW), lambda i: (i, 0, 0)),   # x block
                pl.BlockSpec((tb, cy, HW), lambda i: (i, 0, 0)),   # y block
                const_spec((c, c)),     # fused (dw ∘ pointwise) weight, pre-T
                const_spec((1, c)),     # fused bias
                const_spec((HW, c)),    # LN gamma (channels-last)
                const_spec((HW, c)),    # LN beta  (channels-last)
            ],
            out_specs=pl.BlockSpec((tb, c, HW), lambda i: (i, 0, 0)),
            scratch_shapes=[pltpu.VMEM((tb, HW_PAD, c), x.dtype)],
        ),
        compiler_params=pltpu.CompilerParams(
            dimension_semantics=("parallel",),
            vmem_limit_bytes=int(budget + (8 << 20))),
    )(x3, y3, wt, b_row, gamma_t, beta_t)

    return out[:n].reshape(n, c, H, W)


def init_params(key, out_channel):
    k1, k2, k3, k4, k5, k6 = jax.random.split(key, 6)
    c = out_channel
    return {
        # depthwise 1x1 conv: weight (C,1,1,1) -> (C,1); bias (C,) -> (C,1)
        "w_dw": jax.random.normal(k1, (c, 1), jnp.float32) * 0.5,
        "b_dw": jax.random.normal(k2, (c, 1), jnp.float32) * 0.1,
        # pointwise 1x1 conv: weight (C,C,1,1) -> (C,C); bias (C,) -> (C,1)
        "w_pc": jax.random.normal(k3, (c, c), jnp.float32) * (1.0 / np.sqrt(c)),
        "b_pc": jax.random.normal(k4, (c, 1), jnp.float32) * 0.1,
        # LayerNorm([C,7,7]) affine params, flattened to (C, HW)
        "gamma": 1.0 + 0.1 * jax.random.normal(k5, (c, HW), jnp.float32),
        "beta": 0.1 * jax.random.normal(k6, (c, HW), jnp.float32),
    }


def _reference(x, y, params):
    """Pure-JAX reference of the PyTorch forward (unfused, f32)."""
    n = x.shape[0]
    c = x.shape[1] + y.shape[1]
    r = jnp.concatenate([x, y], axis=1).reshape(n, c, HW).astype(jnp.float32)
    z = r * params["w_dw"].reshape(1, c, 1) + params["b_dw"].reshape(1, c, 1)
    p = jnp.einsum("oc,ncs->nos", params["w_pc"], z,
                   precision=jax.lax.Precision.HIGHEST)
    p = p + params["b_pc"].reshape(1, c, 1)
    mean = jnp.mean(p, axis=(1, 2), keepdims=True)
    var = jnp.mean((p - mean) ** 2, axis=(1, 2), keepdims=True)
    out = (p - mean) / jnp.sqrt(var + LN_EPS)
    out = out * params["gamma"][None] + params["beta"][None]
    return out.reshape(n, c, H, W)


if __name__ == "__main__":
    key = jax.random.PRNGKey(0)
    kx, ky, kp = jax.random.split(key, 3)

    N, CX, CY = 5, 8, 8
    x = jax.random.normal(kx, (N, CX, H, W), jnp.float32)
    y = jax.random.normal(ky, (N, CY, H, W), jnp.float32)
    params = init_params(kp, CX + CY)

    ref = _reference(x, y, params)

    # Default (auto-derived) batch block.
    out = jax.block_until_ready(concat_block_forward(x, y, params))
    np.testing.assert_allclose(np.asarray(out), np.asarray(ref),
                               rtol=2e-5, atol=2e-5)

    # Force a multi-block grid + the ragged-batch (padding) path: TB=2 over N=5.
    out2 = jax.block_until_ready(concat_block_forward(x, y, params, block_b=2))
    np.testing.assert_allclose(np.asarray(out2), np.asarray(ref),
                               rtol=2e-5, atol=2e-5)

    print("KERNEL_OK")
</pallas_src>

<mosaic_0001>
module attributes {stable_mosaic.version = 11 : i64} {
  func.func @_concat_block_kernel(%arg0: i32, %arg1: memref<1x8x49xf32, #tpu.memory_space<vmem>>, %arg2: memref<1x8x49xf32, #tpu.memory_space<vmem>>, %arg3: memref<16x16xf32, #tpu.memory_space<vmem>>, %arg4: memref<1x16xf32, #tpu.memory_space<vmem>>, %arg5: memref<49x16xf32, #tpu.memory_space<vmem>>, %arg6: memref<49x16xf32, #tpu.memory_space<vmem>>, %arg7: memref<1x16x49xf32, #tpu.memory_space<vmem>>, %arg8: memref<1x56x16xf32, #tpu.memory_space<vmem>>) attributes {dimension_semantics = [#tpu.dimension_semantics<parallel>], iteration_bounds = array<i64: 5>, scalar_prefetch = 0 : i64, scratch_operands = 1 : i64, tpu.core_type = #tpu.core_type<tc>, window_params = [{transform_indices = @transform_0, window_bounds = array<i64: 1, 8, 49>}, {transform_indices = @transform_1, window_bounds = array<i64: 1, 8, 49>}, {pipeline_mode = #tpu.pipeline_mode<synchronous>, transform_indices = @transform_2, window_bounds = array<i64: 16, 16>}, {pipeline_mode = #tpu.pipeline_mode<synchronous>, transform_indices = @transform_3, window_bounds = array<i64: 1, 16>}, {pipeline_mode = #tpu.pipeline_mode<synchronous>, transform_indices = @transform_4, window_bounds = array<i64: 49, 16>}, {pipeline_mode = #tpu.pipeline_mode<synchronous>, transform_indices = @transform_5, window_bounds = array<i64: 49, 16>}, {transform_indices = @transform_6, window_bounds = array<i64: 1, 16, 49>}]} {
    %cst = arith.constant 0.000000e+00 : f32
    %0 = vector.broadcast %cst : f32 to vector<1x7x16xf32>
    %c0 = arith.constant 0 : index
    %c49 = arith.constant 49 : index
    %c0_0 = arith.constant 0 : index
    %1 = vector.load %arg8[%c0, %c49, %c0_0] : memref<1x56x16xf32, #tpu.memory_space<vmem>>, vector<1x7x16xf32>
    tpu.vector_store %arg8[%c0, %c49, %c0_0], %0 {strides = array<i32>} : memref<1x56x16xf32, #tpu.memory_space<vmem>>, vector<1x7x16xf32>,
    %c0_1 = arith.constant 0 : index
    %c0_2 = arith.constant 0 : index
    %c0_3 = arith.constant 0 : index
    %2 = vector.load %arg1[%c0_1, %c0_2, %c0_3] : memref<1x8x49xf32, #tpu.memory_space<vmem>>, vector<1x8x49xf32>
    %3 = tpu.transpose %2, [0, 2, 1] : vector<1x8x49xf32> -> vector<1x49x8xf32>
    %c0_4 = arith.constant 0 : index
    %c0_5 = arith.constant 0 : index
    %c0_6 = arith.constant 0 : index
    %4 = vector.load %arg8[%c0_4, %c0_5, %c0_6] : memref<1x56x16xf32, #tpu.memory_space<vmem>>, vector<1x49x8xf32>
    tpu.vector_store %arg8[%c0_4, %c0_5, %c0_6], %3 {strides = array<i32>} : memref<1x56x16xf32, #tpu.memory_space<vmem>>, vector<1x49x8xf32>,
    %c0_7 = arith.constant 0 : index
    %c0_8 = arith.constant 0 : index
    %c0_9 = arith.constant 0 : index
    %5 = vector.load %arg2[%c0_7, %c0_8, %c0_9] : memref<1x8x49xf32, #tpu.memory_space<vmem>>, vector<1x8x49xf32>
    %6 = tpu.transpose %5, [0, 2, 1] : vector<1x8x49xf32> -> vector<1x49x8xf32>
    %c0_10 = arith.constant 0 : index
    %c0_11 = arith.constant 0 : index
    %c8 = arith.constant 8 : index
    %7 = vector.load %arg8[%c0_10, %c0_11, %c8] : memref<1x56x16xf32, #tpu.memory_space<vmem>>, vector<1x49x8xf32>
    tpu.vector_store %arg8[%c0_10, %c0_11, %c8], %6 {strides = array<i32>} : memref<1x56x16xf32, #tpu.memory_space<vmem>>, vector<1x49x8xf32>,
    %c0_12 = arith.constant 0 : index
    %c0_13 = arith.constant 0 : index
    %c0_14 = arith.constant 0 : index
    %8 = vector.load %arg8[%c0_12, %c0_13, %c0_14] : memref<1x56x16xf32, #tpu.memory_space<vmem>>, vector<1x56x16xf32>
    %9 = vector.shape_cast %8 : vector<1x56x16xf32> to vector<56x16xf32>
    %c0_15 = arith.constant 0 : index
    %c0_16 = arith.constant 0 : index
    %10 = vector.load %arg3[%c0_15, %c0_16] : memref<16x16xf32, #tpu.memory_space<vmem>>, vector<16x16xf32>
    %cst_17 = arith.constant dense<0.000000e+00> : vector<56x16xf32>
    %11 = tpu.matmul %9, %10, %cst_17 {dimension_numbers = #tpu.dot_dimension_numbers<[1], [0], [0], [1], [0, 0, 1, 1], [], []>, precision = #tpu.contract_precision<fp32>} : vector<56x16xf32>, vector<16x16xf32>, vector<56x16xf32> -> vector<56x16xf32>
    %12 = vector.shape_cast %11 : vector<56x16xf32> to vector<1x56x16xf32>
    %13 = vector.extract_strided_slice %12 {offsets = [0, 0, 0], sizes = [1, 49, 16], strides = [1, 1, 1]} : vector<1x56x16xf32> to vector<1x49x16xf32>
    %c0_18 = arith.constant 0 : index
    %c0_19 = arith.constant 0 : index
    %14 = vector.load %arg4[%c0_18, %c0_19] : memref<1x16xf32, #tpu.memory_space<vmem>>, vector<1x16xf32>
    %15 = vector.shape_cast %14 : vector<1x16xf32> to vector<1x1x16xf32>
    %16 = vector.broadcast %15 : vector<1x1x16xf32> to vector<1x49x16xf32>
    %17 = arith.addf %13, %16 : vector<1x49x16xf32>
    %cst_20 = arith.constant dense<0.000000e+00> : vector<1x49xf32>
    %18 = vector.multi_reduction <add>, %17, %cst_20 [2] : vector<1x49x16xf32> to vector<1x49xf32>
    %19 = vector.shape_cast %18 : vector<1x49xf32> to vector<1x49x1xf32>
    %cst_21 = arith.constant dense<0.000000e+00> : vector<1x1xf32>
    %20 = vector.multi_reduction <add>, %19, %cst_21 [1] : vector<1x49x1xf32> to vector<1x1xf32>
    %21 = vector.shape_cast %20 : vector<1x1xf32> to vector<1x1x1xf32>
    %cst_22 = arith.constant 0.00127551018 : f32
    %22 = vector.broadcast %cst_22 : f32 to vector<1x1x1xf32>
    %23 = arith.mulf %21, %22 : vector<1x1x1xf32>
    %24 = vector.broadcast %23 : vector<1x1x1xf32> to vector<1x49x16xf32>
    %25 = arith.subf %17, %24 : vector<1x49x16xf32>
    %26 = arith.mulf %25, %25 : vector<1x49x16xf32>
    %cst_23 = arith.constant dense<0.000000e+00> : vector<1x49xf32>
    %27 = vector.multi_reduction <add>, %26, %cst_23 [2] : vector<1x49x16xf32> to vector<1x49xf32>
    %28 = vector.shape_cast %27 : vector<1x49xf32> to vector<1x49x1xf32>
    %cst_24 = arith.constant dense<0.000000e+00> : vector<1x1xf32>
    %29 = vector.multi_reduction <add>, %28, %cst_24 [1] : vector<1x49x1xf32> to vector<1x1xf32>
    %30 = vector.shape_cast %29 : vector<1x1xf32> to vector<1x1x1xf32>
    %cst_25 = arith.constant 0.00127551018 : f32
    %31 = vector.broadcast %cst_25 : f32 to vector<1x1x1xf32>
    %32 = arith.mulf %30, %31 : vector<1x1x1xf32>
    %cst_26 = arith.constant 9.99999974E-6 : f32
    %33 = vector.broadcast %cst_26 : f32 to vector<1x1x1xf32>
    %34 = arith.addf %32, %33 : vector<1x1x1xf32>
    %35 = math.rsqrt %34 : vector<1x1x1xf32>
    %36 = vector.broadcast %35 : vector<1x1x1xf32> to vector<1x49x16xf32>
    %37 = arith.mulf %25, %36 : vector<1x49x16xf32>
    %c0_27 = arith.constant 0 : index
    %c0_28 = arith.constant 0 : index
    %38 = vector.load %arg5[%c0_27, %c0_28] : memref<49x16xf32, #tpu.memory_space<vmem>>, vector<49x16xf32>
    %39 = vector.shape_cast %38 : vector<49x16xf32> to vector<1x49x16xf32>
    %40 = arith.mulf %37, %39 : vector<1x49x16xf32>
    %c0_29 = arith.constant 0 : index
    %c0_30 = arith.constant 0 : index
    %41 = vector.load %arg6[%c0_29, %c0_30] : memref<49x16xf32, #tpu.memory_space<vmem>>, vector<49x16xf32>
    %42 = vector.shape_cast %41 : vector<49x16xf32> to vector<1x49x16xf32>
    %43 = arith.addf %40, %42 : vector<1x49x16xf32>
    %44 = tpu.transpose %43, [0, 2, 1] : vector<1x49x16xf32> -> vector<1x16x49xf32>
    %c0_31 = arith.constant 0 : index
    %c0_32 = arith.constant 0 : index
    %c0_33 = arith.constant 0 : index
    %45 = vector.load %arg7[%c0_31, %c0_32, %c0_33] : memref<1x16x49xf32, #tpu.memory_space<vmem>>, vector<1x16x49xf32>
    tpu.vector_store %arg7[%c0_31, %c0_32, %c0_33], %44 {strides = array<i32>} : memref<1x16x49xf32, #tpu.memory_space<vmem>>, vector<1x16x49xf32>,
    return
  }
  func.func @transform_0(%arg0: i32) -> (i32, i32, i32) {
    %c0_i32 = arith.constant 0 : i32
    %c0_i32_0 = arith.constant 0 : i32
    %c0_i32_1 = arith.constant 0 : i32
    return %arg0, %c0_i32, %c0_i32_0 : i32, i32, i32
  }
  func.func @transform_1(%arg0: i32) -> (i32, i32, i32) {
    %c0_i32 = arith.constant 0 : i32
    %c0_i32_0 = arith.constant 0 : i32
    %c0_i32_1 = arith.constant 0 : i32
    return %arg0, %c0_i32, %c0_i32_0 : i32, i32, i32
  }
  func.func @transform_2(%arg0: i32) -> (i32, i32) {
    %c0_i32 = arith.constant 0 : i32
    %c0_i32_0 = arith.constant 0 : i32
    %c0_i32_1 = arith.constant 0 : i32
    return %c0_i32, %c0_i32_0 : i32, i32
  }
  func.func @transform_3(%arg0: i32) -> (i32, i32) {
    %c0_i32 = arith.constant 0 : i32
    %c0_i32_0 = arith.constant 0 : i32
    %c0_i32_1 = arith.constant 0 : i32
    return %c0_i32, %c0_i32_0 : i32, i32
  }
  func.func @transform_4(%arg0: i32) -> (i32, i32) {
    %c0_i32 = arith.constant 0 : i32
    %c0_i32_0 = arith.constant 0 : i32
    %c0_i32_1 = arith.constant 0 : i32
    return %c0_i32, %c0_i32_0 : i32, i32
  }
  func.func @transform_5(%arg0: i32) -> (i32, i32) {
    %c0_i32 = arith.constant 0 : i32
    %c0_i32_0 = arith.constant 0 : i32
    %c0_i32_1 = arith.constant 0 : i32
    return %c0_i32, %c0_i32_0 : i32, i32
  }
  func.func @transform_6(%arg0: i32) -> (i32, i32, i32) {
    %c0_i32 = arith.constant 0 : i32
    %c0_i32_0 = arith.constant 0 : i32
    %c0_i32_1 = arith.constant 0 : i32
    return %arg0, %c0_i32, %c0_i32_0 : i32, i32, i32
  }
}

</mosaic_0001>

<bundles_post_ra>
// kernel: concat_block_forward.1
= control target key start
LH: loop header
LB: loop body
LE: loop exit
PB: predicated region body
PF: predicated region fallthrough
CT: control target
= control target key end

     0   :  { %s1643_s21 = smov 0   ;;  %s2006_s0 = inlined_call_operand.vmem [shape: f32[5,8,49], index: 0, kind: input, shape index: {}]   ;;  %s2007_s1 = inlined_call_operand.vmem [shape: f32[5,8,49], index: 1, kind: input, shape index: {}]   ;;  %s2008_s2 = inlined_call_operand.vmem [shape: f32[16,16], index: 2, kind: input, shape index: {}]   ;;  %s2009_s3 = inlined_call_operand.vmem [shape: f32[1,16], index: 3, kind: input, shape index: {}]   ;;  %s2010_s4 = inlined_call_operand.vmem [shape: f32[49,16], index: 4, kind: input, shape index: {}]   ;;  %s2011_s5 = inlined_call_operand.vmem [shape: f32[49,16], index: 5, kind: input, shape index: {}]   ;;  %s2012_s6 = inlined_call_operand.vmem [shape: f32[5,16,49], index: 6, kind: output, shape index: {}]  }
   0x1 LB: > { %s1367_s22 = sadd.s32 4294967295, %s1603_s21   ;;  %p1371_p0 = scmp.ge.s32.totalorder %s1603_s21, 1  ;;  %s1603_s21 = sphi %s1643_s21, %s16_s21  }
   0x2   : > { %p220_p1 = scmp.lt.s32.totalorder %s1603_s21, 6 }
   0x4   : > { %p221_p2 = pnand %p1371_p0, %p220_p1 }
   0x5   : > { %p253_p3 = scmp.lt.s32.totalorder (!%p221_p2), %s1367_s22, 4  ;;  %s1607_s10 = smov (!%p221_p2), 8  }
   0x6   : > { %224 = sbr.rel (%p221_p2) target bundleno = 1045 (0x415), region = 44 }
   0xb   : > { %s2014_s22 = smov (!%p253_p3, %s1367_s22), 4  ;;  %v388_v2 = vld [vmem:[%s2008_s2 + $0x8] sm:$0xff]  ;;  %v387_v4 = vld [vmem:[%s2008_s2] sm:$0xff]  ;;  %v1605_v11 = vmov 0.0   ;;  %vm1606_vm0 = vmmov 0   ;;  %vm301_vm1 = vcmask 64512  }
   0xc   : > { %s1372_s23 = sshll.u32 %s2014_s22, 3  ;;  %v1663_v3 = vand.u32 4294901760, %v388_v2  ;;  %v1671_v6 = vand.u32 4294901760, %v387_v4  ;;  %1459 = vmatprep.subr.mxu1 %v1605_v11  ;;  %1434 = vmatprep.subr.mxu0 %v1605_v11  ;;  %vm266_vm2 = vcmask 129024   ;;  %vm308_vm3 = vcmask 57344   ;;  %s1379_s19 = sshll.u32 %s2014_s22, 4 }
   0xd   : > { %s260_s26 = scalar_lea.vmem %s2007_s1, %s1372_s23  ;;  %s256_s29 = scalar_lea.vmem %s2006_s0, %s1372_s23  ;;  %1463 = vmatprep.mubr.msk.f32.mxu1 %vm1606_vm0, %v1605_v11  ;;  %1438 = vmatprep.mubr.msk.f32.mxu0 %vm1606_vm0, %v1605_v11  ;;  %267 = vst.msk [vmem:[#allocation2 + $0x31] sm:$0x7f] %vm266_vm2, %v1605_v11  ;;  %vm371_vm4 = vcmask 130112   ;;  %vm389_vm5 = vcmask 130048   ;;  %vm378_vm6 = vcmask 122944   ;;  %vm1160_vm7 = vcmask 122880  }
   0xe   : > { %v310_v0 = vld [vmem:[%s260_s26] sm:$0xff]  ;;  %v1669_v5 = vsub.f32 %v388_v2, %v1663_v3  ;;  %v1675_v8 = vsub.f32 %v387_v4, %v1671_v6  ;;  %1435 = vmatpush3.msra.mxu0 %v1663_v3  ;;  %vm1169_vm8 = vcmask 1040384   ;;  %s265_s24 = scalar_lea.vmem %s2012_s6, %s1379_s19  ;;  %vm1297_vm9 = vcmask 400384  }
   0xf   : > { %v268_v1 = vld [vmem:[%s256_s29] sm:$0xff]  ;;  %311 = vxpose.xlu0.b32.start.end [1/1] (short) (narrow) %v310_v0, 56  ;;  %1436 = vmatprep.subr.mxu0 %v1605_v11 }
  0x10   : > { %269 = vxpose.xlu1.b32.start.end [1/1] (short) (narrow) %v268_v1, 56  ;;  %v579_v7 = vand.u32 4294901760, %v1669_v5  ;;  %v586_v10 = vand.u32 4294901760, %v1675_v8  ;;  %1437 = vmatpush3.msra.mxu0 %v1671_v6 }
  0x11   : > { %1484 = vmatprep.subr.mxu0 %v1605_v11 }
  0x12   : > { %v580_v9 = vsub.f32 %v1669_v5, %v579_v7  ;;  %v587_v13 = vsub.f32 %v1675_v8, %v586_v10 }
  0x14   : > { %v581_v12 = vand.u32 4294901760, %v580_v9  ;;  %v588_v14 = vand.u32 4294901760, %v587_v13 }
  0x16   : > { %1460 = vmatpush3.msra.mxu1 %v581_v12 }
  0x17   : > { %1461 = vmatprep.subr.mxu1 %v1605_v11 }
  0x18   : > { %1462 = vmatpush3.msra.mxu1 %v588_v14 }
  0x19   : > { %1509 = vmatprep.subr.mxu1 %v1605_v11 }
  0x8b   : > { %v327_v15 = vpop.trf.xlu0 }
  0x8c   : > { %v285_v16 = vpop.trf.xlu1  ;;  %350 = vrot.lane.b32.xlu0 %v327_v15, %s1607_s10 }
  0x8d   : > { %302 = vst.msk [vmem:[#allocation2] sm:$0xff] %vm301_vm1, %v285_v16 }
  0x8f   : > { %v328_v17 = vpop.trf.xlu0 }
  0x90   : > { %v286_v18 = vpop.trf.xlu1  ;;  %352 = vrot.lane.b32.xlu1 %v328_v17, %s1607_s10 }
  0x91   : > { %303 = vst.msk [vmem:[#allocation2 + $0x8] sm:$0xff] %vm301_vm1, %v286_v18 }
  0x93   : > { %v329_v19 = vpop.trf.xlu0 }
  0x94   : > { %v287_v20 = vpop.trf.xlu1  ;;  %354 = vrot.lane.b32.xlu1 %v329_v19, %s1607_s10 }
  0x95   : > { %304 = vst.msk [vmem:[#allocation2 + $0x10] sm:$0xff] %vm301_vm1, %v287_v20 }
  0x97   : > { %v330_v21 = vpop.trf.xlu0 }
  0x98   : > { %v288_v22 = vpop.trf.xlu1  ;;  %356 = vrot.lane.b32.xlu1 %v330_v21, %s1607_s10 }
  0x99   : > { %305 = vst.msk [vmem:[#allocation2 + $0x18] sm:$0xff] %vm301_vm1, %v288_v22 }
  0x9b   : > { %v331_v23 = vpop.trf.xlu0 }
  0x9c   : > { %v289_v24 = vpop.trf.xlu1  ;;  %358 = vrot.lane.b32.xlu1 %v331_v23, %s1607_s10 }
  0x9d   : > { %306 = vst.msk [vmem:[#allocation2 + $0x20] sm:$0xff] %vm301_vm1, %v289_v24 }
  0x9f   : > { %v332_v25 = vpop.trf.xlu0 }
  0xa0   : > { %v290_v26 = vpop.trf.xlu1  ;;  %360 = vrot.lane.b32.xlu1 %v332_v25, %s1607_s10 }
  0xa1   : > { %307 = vst.msk [vmem:[#allocation2 + $0x28] sm:$0xff] %vm301_vm1, %v290_v26 }
  0xa3   : > { %v333_v27 = vpop.trf.xlu0 }
  0xa4   : > { %v291_v28 = vpop.trf.xlu1  ;;  %362 = vrot.lane.b32.xlu1 %v333_v27, %s1607_s10 }
  0xa5   : > { %309 = vst.msk [vmem:[#allocation2 + $0x30] sm:$0x1] %vm308_vm3, %v291_v28 }
  0xfe   : > { %v351_v29 = vpop.permute.xlu0 %350 }
  0xff   : > { %372 = vst.msk [vmem:[#allocation2] sm:$0xff] %vm371_vm4, %v351_v29 }
 0x102   : > { %v353_v30 = vpop.permute.xlu1 %352 }
 0x103   : > { %373 = vst.msk [vmem:[#allocation2 + $0x8] sm:$0xff] %vm371_vm4, %v353_v30 }
 0x106   : > { %v355_v31 = vpop.permute.xlu1 %354  ;;  %v380_v32 = vld [vmem:[#allocation2] sm:$0xff] }
 0x107   : > { %374 = vst.msk [vmem:[#allocation2 + $0x10] sm:$0xff] %vm371_vm4, %v355_v31  ;;  %v391_v33 = vsel %vm389_vm5, %v380_v32, 0 }
 0x108   : > { %v1707_v34 = vand.u32 4294901760, %v391_v33 }
 0x10a   : > { %1464 = vmatmul.mubr.f32.vlgmr.msra.gmra.mxu1 %v1707_v34  ;;  %v357_v35 = vpop.permute.xlu1 %356  ;;  %v381_v36 = vld [vmem:[#allocation2 + $0x8] sm:$0xff]  ;;  %v1711_v37 = vsub.f32 %v391_v33, %v1707_v34 }
 0x10b   : > { %375 = vst.msk [vmem:[#allocation2 + $0x18] sm:$0xff] %vm371_vm4, %v357_v35  ;;  %1466 = vmatprep.mubr.msk.f32.mxu1 %vm1606_vm0, %v1605_v11  ;;  %v394_v38 = vsel %vm389_vm5, %v381_v36, 0  ;;  %1510 = vmatpush3.msra.mxu1 %v1663_v3 }
 0x10c   : > { %v1718_v39 = vand.u32 4294901760, %v394_v38  ;;  %v480_v40 = vand.u32 4294901760, %v1711_v37  ;;  %1511 = vmatprep.subr.mxu1 %v1605_v11 }
 0x10d   : > { %1512 = vmatpush3.msra.mxu1 %v1671_v6 }
 0x10e   : > { %1467 = vmatmul.mubr.f32.gmra.mxu1 %v1718_v39  ;;  %v359_v41 = vpop.permute.xlu1 %358  ;;  %v481_v42 = vsub.f32 %v1711_v37, %v480_v40  ;;  %v382_v43 = vld [vmem:[#allocation2 + $0x10] sm:$0xff]  ;;  %v1728_v44 = vsub.f32 %v394_v38, %v1718_v39  ;;  %1559 = vmatprep.subr.mxu1 %v1605_v11 }
 0x10f   : > { %376 = vst.msk [vmem:[#allocation2 + $0x20] sm:$0xff] %vm371_vm4, %v359_v41  ;;  %1469 = vmatprep.mubr.msk.f32.mxu1 %vm1606_vm0, %v1605_v11  ;;  %v397_v45 = vsel %vm389_vm5, %v382_v43, 0 }
 0x110   : > { %v482_v46 = vand.u32 4294901760, %v481_v42  ;;  %v1735_v47 = vand.u32 4294901760, %v397_v45  ;;  %v490_v48 = vand.u32 4294901760, %v1728_v44 }
 0x112   : > { %1439 = vmatmul.mubr.f32.vlgmr.msra.gmra.mxu0 %v482_v46  ;;  %1470 = vmatmul.mubr.f32.gmra.mxu1 %v1735_v47  ;;  %v361_v49 = vpop.permute.xlu1 %360  ;;  %v491_v50 = vsub.f32 %v1728_v44, %v490_v48  ;;  %v383_v51 = vld [vmem:[#allocation2 + $0x18] sm:$0xff]  ;;  %v1743_v52 = vsub.f32 %v397_v45, %v1735_v47 }
 0x113   : > { %1485 = vmatpush3.msra.mxu0 %v1669_v5  ;;  %377 = vst.msk [vmem:[#allocation2 + $0x28] sm:$0xff] %vm371_vm4, %v361_v49  ;;  %1441 = vmatprep.mubr.msk.f32.mxu0 %vm1606_vm0, %v1605_v11  ;;  %v400_v53 = vsel %vm389_vm5, %v383_v51, 0 }
 0x114   : > { %1472 = vmatprep.mubr.msk.f32.mxu1 %vm1606_vm0, %v1605_v11  ;;  %v492_v54 = vand.u32 4294901760, %v491_v50  ;;  %v1752_v55 = vand.u32 4294901760, %v400_v53  ;;  %v500_v56 = vand.u32 4294901760, %v1743_v52  ;;  %1486 = vmatprep.subr.mxu0 %v1605_v11 }
 0x115   : > { %1487 = vmatpush3.msra.mxu0 %v1675_v8 }
 0x116   : > { %1442 = vmatmul.mubr.f32.gmra.mxu0 %v492_v54  ;;  %1473 = vmatmul.mubr.f32.gmra.mxu1 %v1752_v55  ;;  %v363_v57 = vpop.permute.xlu1 %362  ;;  %v501_v58 = vsub.f32 %v1743_v52, %v500_v56  ;;  %v384_v59 = vld [vmem:[#allocation2 + $0x20] sm:$0xff]  ;;  %v1760_v60 = vsub.f32 %v400_v53, %v1752_v55 }
 0x117   : > { %379 = vst.msk [vmem:[#allocation2 + $0x30] sm:$0x1] %vm378_vm6, %v363_v57  ;;  %1444 = vmatprep.mubr.msk.f32.mxu0 %vm1606_vm0, %v1605_v11  ;;  %1475 = vmatprep.mubr.msk.f32.mxu1 %vm1606_vm0, %v1605_v11  ;;  %v403_v61 = vsel %vm389_vm5, %v384_v59, 0 }
 0x118   : > { %v502_v62 = vand.u32 4294901760, %v501_v58  ;;  %v1767_v63 = vand.u32 4294901760, %v403_v61  ;;  %v510_v0 = vand.u32 4294901760, %v1760_v60  ;;  %1534 = vmatprep.subr.mxu0 %v1605_v11 }
 0x11a   : > { %1445 = vmatmul.mubr.f32.gmra.mxu0 %v502_v62  ;;  %1476 = vmatmul.mubr.f32.gmra.mxu1 %v1767_v63  ;;  %v511_v1 = vsub.f32 %v1760_v60, %v510_v0  ;;  %v385_v2 = vld [vmem:[#allocation2 + $0x28] sm:$0xff]  ;;  %v519_v4 = vsub.f32 %v403_v61, %v1767_v63 }
 0x11b   : > { %1447 = vmatprep.mubr.msk.f32.mxu0 %vm1606_vm0, %v1605_v11  ;;  %1478 = vmatprep.mubr.msk.f32.mxu1 %vm1606_vm0, %v1605_v11  ;;  %v406_v9 = vsel %vm389_vm5, %v385_v2, 0 }
 0x11c   : > { %v512_v12 = vand.u32 4294901760, %v511_v1  ;;  %v1779_v13 = vand.u32 4294901760, %v406_v9  ;;  %v520_v14 = vand.u32 4294901760, %v519_v4 }
 0x11e   : > { %1448 = vmatmul.mubr.f32.gmra.mxu0 %v512_v12  ;;  %1479 = vmatmul.mubr.f32.gmra.mxu1 %v1779_v13  ;;  %v521_v15 = vsub.f32 %v519_v4, %v520_v14  ;;  %v386_v16 = vld [vmem:[#allocation2 + $0x30] sm:$0xff]  ;;  %v529_v17 = vsub.f32 %v406_v9, %v1779_v13 }
 0x11f   : > { %1450 = vmatprep.mubr.msk.f32.mxu0 %vm1606_vm0, %v1605_v11  ;;  %1481 = vmatprep.mubr.msk.f32.mxu1 %vm1606_vm0, %v1605_v11  ;;  %v409_v18 = vsel %vm389_vm5, %v386_v16, 0 }
 0x120   : > { %v522_v19 = vand.u32 4294901760, %v521_v15  ;;  %v1788_v20 = vand.u32 4294901760, %v409_v18  ;;  %v530_v21 = vand.u32 4294901760, %v529_v17 }
 0x122   : > { %1451 = vmatmul.mubr.f32.gmra.mxu0 %v522_v19  ;;  %1482 = vmatmul.mubr.f32.gmra.mxu1 %v1788_v20  ;;  %v531_v22 = vsub.f32 %v529_v17, %v530_v21  ;;  %v539_v23 = vsub.f32 %v409_v18, %v1788_v20 }
 0x123   : > { %1453 = vmatprep.mubr.msk.f32.mxu0 %vm1606_vm0, %v1605_v11  ;;  %1513 = vmatprep.mubr.msk.f32.mxu1 %vm1606_vm0, %v1605_v11 }
 0x124   : > { %v532_v24 = vand.u32 4294901760, %v531_v22  ;;  %v540_v25 = vand.u32 4294901760, %v539_v23 }
 0x126   : > { %1454 = vmatmul.mubr.f32.gmra.mxu0 %v532_v24  ;;  %1514 = vmatmul.mubr.f32.vlgmr.msra.gmra.mxu1 %v480_v40  ;;  %v541_v26 = vsub.f32 %v539_v23, %v540_v25 }
 0x127   : > { %1456 = vmatprep.mubr.msk.f32.mxu0 %vm1606_vm0, %v1605_v11  ;;  %1516 = vmatprep.mubr.msk.f32.mxu1 %vm1606_vm0, %v1605_v11 }
 0x128   : > { %v542_v27 = vand.u32 4294901760, %v541_v26  ;;  %1560 = vmatpush3.msra.mxu1 %v1663_v3 }
 0x129   : > { %1561 = vmatprep.subr.mxu1 %v1605_v11 }
 0x12a   : > { %1457 = vmatmul.mubr.f32.gmra.mxu0 %v542_v27  ;;  %1517 = vmatmul.mubr.f32.gmra.mxu1 %v490_v48 }
 0x12b   : > { %1488 = vmatprep.mubr.msk.f32.mxu0 %vm1606_vm0, %v1605_v11  ;;  %1519 = vmatprep.mubr.msk.f32.mxu1 %vm1606_vm0, %v1605_v11 }
 0x12c   : > { %1562 = vmatpush3.msra.mxu1 %v1671_v6 }
 0x12e   : > { %1489 = vmatmul.mubr.f32.vlgmr.msra.gmra.mxu0 %v1711_v37  ;;  %1520 = vmatmul.mubr.f32.gmra.mxu1 %v500_v56 }
 0x12f   : > { %1535 = vmatpush3.msra.mxu0 %v579_v7  ;;  %1491 = vmatprep.mubr.msk.f32.mxu0 %vm1606_vm0, %v1605_v11 }
 0x130   : > { %1522 = vmatprep.mubr.msk.f32.mxu1 %vm1606_vm0, %v1605_v11  ;;  %1536 = vmatprep.subr.mxu0 %v1605_v11 }
 0x131   : > { %1537 = vmatpush3.msra.mxu0 %v586_v10 }
 0x132   : > { %1492 = vmatmul.mubr.f32.gmra.mxu0 %v1728_v44  ;;  %1523 = vmatmul.mubr.f32.gmra.mxu1 %v510_v0 }
 0x133   : > { %1494 = vmatprep.mubr.msk.f32.mxu0 %vm1606_vm0, %v1605_v11  ;;  %1525 = vmatprep.mubr.msk.f32.mxu1 %vm1606_vm0, %v1605_v11 }
 0x136   : > { %1495 = vmatmul.mubr.f32.gmra.mxu0 %v1743_v52  ;;  %1526 = vmatmul.mubr.f32.gmra.mxu1 %v520_v14 }
 0x137   : > { %1497 = vmatprep.mubr.msk.f32.mxu0 %vm1606_vm0, %v1605_v11  ;;  %1528 = vmatprep.mubr.msk.f32.mxu1 %vm1606_vm0, %v1605_v11 }
 0x13a   : > { %1498 = vmatmul.mubr.f32.gmra.mxu0 %v1760_v60  ;;  %1529 = vmatmul.mubr.f32.gmra.mxu1 %v530_v21 }
 0x13b   : > { %1500 = vmatprep.mubr.msk.f32.mxu0 %vm1606_vm0, %v1605_v11  ;;  %1531 = vmatprep.mubr.msk.f32.mxu1 %vm1606_vm0, %v1605_v11 }
 0x13e   : > { %1501 = vmatmul.mubr.f32.gmra.mxu0 %v519_v4  ;;  %1532 = vmatmul.mubr.f32.gmra.mxu1 %v540_v25 }
 0x13f   : > { %1503 = vmatprep.mubr.msk.f32.mxu0 %vm1606_vm0, %v1605_v11  ;;  %1563 = vmatprep.mubr.msk.f32.mxu1 %vm1606_vm0, %v1605_v11 }
 0x142   : > { %1504 = vmatmul.mubr.f32.gmra.mxu0 %v529_v17  ;;  %1564 = vmatmul.mubr.f32.vlgmr.msra.gmra.mxu1 %v1707_v34 }
 0x143   : > { %1506 = vmatprep.mubr.msk.f32.mxu0 %vm1606_vm0, %v1605_v11  ;;  %1566 = vmatprep.mubr.msk.f32.mxu1 %vm1606_vm0, %v1605_v11 }
 0x146   : > { %1507 = vmatmul.mubr.f32.gmra.mxu0 %v539_v23  ;;  %1567 = vmatmul.mubr.f32.gmra.mxu1 %v1718_v39 }
 0x147   : > { %1538 = vmatprep.mubr.msk.f32.mxu0 %vm1606_vm0, %v1605_v11  ;;  %1569 = vmatprep.mubr.msk.f32.mxu1 %vm1606_vm0, %v1605_v11 }
 0x14a   : > { %1539 = vmatmul.mubr.f32.vlgmr.msra.gmra.mxu0 %v1707_v34  ;;  %1570 = vmatmul.mubr.f32.gmra.mxu1 %v1735_v47 }
 0x14b   : > { %1541 = vmatprep.mubr.msk.f32.mxu0 %vm1606_vm0, %v1605_v11  ;;  %1572 = vmatprep.mubr.msk.f32.mxu1 %vm1606_vm0, %v1605_v11 }
 0x14e   : > { %1542 = vmatmul.mubr.f32.gmra.mxu0 %v1718_v39  ;;  %1573 = vmatmul.mubr.f32.gmra.mxu1 %v1752_v55 }
 0x14f   : > { %1544 = vmatprep.mubr.msk.f32.mxu0 %vm1606_vm0, %v1605_v11  ;;  %1575 = vmatprep.mubr.msk.f32.mxu1 %vm1606_vm0, %v1605_v11 }
 0x152   : > { %1545 = vmatmul.mubr.f32.gmra.mxu0 %v1735_v47  ;;  %1576 = vmatmul.mubr.f32.gmra.mxu1 %v1767_v63 }
 0x153   : > { %1547 = vmatprep.mubr.msk.f32.mxu0 %vm1606_vm0, %v1605_v11  ;;  %1578 = vmatprep.mubr.msk.f32.mxu1 %vm1606_vm0, %v1605_v11 }
 0x156   : > { %1548 = vmatmul.mubr.f32.gmra.mxu0 %v1752_v55  ;;  %1579 = vmatmul.mubr.f32.gmra.mxu1 %v1779_v13 }
 0x157   : > { %1550 = vmatprep.mubr.msk.f32.mxu0 %vm1606_vm0, %v1605_v11  ;;  %1581 = vmatprep.mubr.msk.f32.mxu1 %vm1606_vm0, %v1605_v11 }
 0x15a   : > { %1551 = vmatmul.mubr.f32.gmra.mxu0 %v1767_v63  ;;  %1582 = vmatmul.mubr.f32.gmra.mxu1 %v1788_v20 }
 0x15b   : > { %1553 = vmatprep.mubr.msk.f32.mxu0 %vm1606_vm0, %v1605_v11 }
 0x15e   : > { %1554 = vmatmul.mubr.f32.gmra.mxu0 %v1779_v13 }
 0x15f   : > { %1556 = vmatprep.mubr.msk.f32.mxu0 %vm1606_vm0, %v1605_v11 }
 0x162   : > { %1557 = vmatmul.mubr.f32.gmra.mxu0 %v1788_v20 }
 0x1ca   : > { %v625_v3 = vpop.f32.mrf.mxu1 }
 0x1cc   : > { %v1465_v5 = vpop.f32.mrf.mxu1 }
 0x1ce   : > { %v631_v6 = vpop.f32.mrf.mxu1 }
 0x1d0   : > { %v1468_v7 = vpop.f32.mrf.mxu1 }
 0x1d2   : > { %v484_v8 = vpop.f32.mrf.mxu0  ;;  %v637_v10 = vpop.f32.mrf.mxu1 }
 0x1d3   : > { %v626_v18 = vadd.f32 %v625_v3, %v484_v8  ;;  %v1905_v3 = vld [vmem:[%s2009_s3] ss:$0 sm:$0xff] }
 0x1d4   : > { %v1440_v28 = vpop.f32.mrf.mxu0  ;;  %v1471_v29 = vpop.f32.mrf.mxu1 }
 0x1d6   : > { %v494_v30 = vpop.f32.mrf.mxu0  ;;  %v1882_v31 = vpop.f32.mrf.mxu1 }
 0x1d7   : > { %v632_v24 = vadd.f32 %v631_v6, %v494_v30 }
 0x1d8   : > { %v1443_v32 = vpop.f32.mrf.mxu0  ;;  %v1474_v33 = vpop.f32.mrf.mxu1 }
 0x1da   : > { %v504_v34 = vpop.f32.mrf.mxu0  ;;  %v1884_v35 = vpop.f32.mrf.mxu1 }
 0x1db   : > { %v638_v29 = vadd.f32 %v637_v10, %v504_v34 }
 0x1dc   : > { %v1446_v36 = vpop.f32.mrf.mxu0  ;;  %v1477_v11 = vpop.f32.mrf.mxu1 }
 0x1de   : > { %v514_v37 = vpop.f32.mrf.mxu0  ;;  %v1886_v38 = vpop.f32.mrf.mxu1 }
 0x1df   : > { %v644_v30 = vadd.f32 %v1882_v31, %v514_v37 }
 0x1e0   : > { %v1449_v39 = vpop.f32.mrf.mxu0  ;;  %v1480_v40 = vpop.f32.mrf.mxu1 }
 0x1e2   : > { %v1888_v41 = vpop.f32.mrf.mxu0  ;;  %v1890_v42 = vpop.f32.mrf.mxu1 }
 0x1e4   : > { %v1452_v43 = vpop.f32.mrf.mxu0  ;;  %v1483_v44 = vpop.f32.mrf.mxu1 }
 0x1e6   : > { %v1892_v45 = vpop.f32.mrf.mxu0  ;;  %v854_v46 = vpop.f32.mrf.mxu1 }
 0x1e8   : > { %v1455_v47 = vpop.f32.mrf.mxu0  ;;  %v1515_v48 = vpop.f32.mrf.mxu1 }
 0x1ea   : > { %v1894_v49 = vpop.f32.mrf.mxu0  ;;  %v862_v50 = vpop.f32.mrf.mxu1 }
 0x1ec   : > { %v1458_v51 = vpop.f32.mrf.mxu0  ;;  %v1518_v52 = vpop.f32.mrf.mxu1 }
 0x1ee   : > { %v737_v53 = vpop.f32.mrf.mxu0  ;;  %v870_v54 = vpop.f32.mrf.mxu1 }
 0x1ef   : > { %v738_v21 = vadd.f32 %v737_v53, %v626_v18  ;;  %v662_v18 = vadd.f32 %v1890_v42, %v1894_v49 }
 0x1f0   : > { %v1490_v55 = vpop.f32.mrf.mxu0  ;;  %v1521_v56 = vpop.f32.mrf.mxu1 }
 0x1f1   : > { %v855_v5 = vadd.f32 %v854_v46, %v738_v21 }
 0x1f2   : > { %v744_v57 = vpop.f32.mrf.mxu0  ;;  %v878_v58 = vpop.f32.mrf.mxu1 }
 0x1f3   : > { %v745_v27 = vadd.f32 %v744_v57, %v632_v24 }
 0x1f4   : > { %v1493_v59 = vpop.f32.mrf.mxu0  ;;  %v1524_v60 = vpop.f32.mrf.mxu1 }
 0x1f5   : > { %v863_v39 = vadd.f32 %v862_v50, %v745_v27  ;;  %v650_v50 = vadd.f32 %v1884_v35, %v1888_v41 }
 0x1f6   : > { %v751_v61 = vpop.f32.mrf.mxu0  ;;  %v1896_v62 = vpop.f32.mrf.mxu1 }
 0x1f7   : > { %v752_v8 = vadd.f32 %v751_v61, %v638_v29 }
 0x1f8   : > { %v1496_v63 = vpop.f32.mrf.mxu0  ;;  %v1527_v0 = vpop.f32.mrf.mxu1 }
 0x1f9   : > { %v871_v51 = vadd.f32 %v870_v54, %v752_v8  ;;  %v656_v0 = vadd.f32 %v1886_v38, %v1892_v45 }
 0x1fa   : > { %v758_v1 = vpop.f32.mrf.mxu0  ;;  %v1898_v2 = vpop.f32.mrf.mxu1 }
 0x1fb   : > { %v759_v46 = vadd.f32 %v758_v1, %v644_v30 }
 0x1fc   : > { %v1499_v4 = vpop.f32.mrf.mxu0  ;;  %v1530_v9 = vpop.f32.mrf.mxu1 }
 0x1fd   : > { %v879_v61 = vadd.f32 %v878_v58, %v759_v46 }
 0x1fe   : > { %v765_v12 = vpop.f32.mrf.mxu0  ;;  %v1900_v13 = vpop.f32.mrf.mxu1 }
 0x1ff   : > { %v766_v57 = vadd.f32 %v765_v12, %v650_v50 }
 0x200   : > { %v1502_v14 = vpop.f32.mrf.mxu0  ;;  %v1533_v15 = vpop.f32.mrf.mxu1 }
 0x201   : > { %v887_v15 = vadd.f32 %v1896_v62, %v766_v57 }
 0x202   : > { %v772_v16 = vpop.f32.mrf.mxu0  ;;  %v1088_v17 = vpop.f32.mrf.mxu1 }
 0x203   : > { %v773_v9 = vadd.f32 %v772_v16, %v656_v0 }
 0x204   : > { %v1505_v19 = vpop.f32.mrf.mxu0  ;;  %v1565_v20 = vpop.f32.mrf.mxu1 }
 0x205   : > { %v895_v24 = vadd.f32 %v1898_v2, %v773_v9 }
 0x206   : > { %v779_v22 = vpop.f32.mrf.mxu0  ;;  %v1094_v23 = vpop.f32.mrf.mxu1 }
 0x207   : > { %v780_v21 = vadd.f32 %v779_v22, %v662_v18 }
 0x208   : > { %v1508_v25 = vpop.f32.mrf.mxu0  ;;  %v1568_v26 = vpop.f32.mrf.mxu1 }
 0x209   : > { %v903_v49 = vadd.f32 %v1900_v13, %v780_v21 }
 0x20a   : > { %v979_v7 = vpop.f32.mrf.mxu0  ;;  %v1100_v28 = vpop.f32.mrf.mxu1 }
 0x20b   : > { %v980_v32 = vadd.f32 %v979_v7, %v855_v5 }
 0x20c   : > { %v1540_v33 = vpop.f32.mrf.mxu0  ;;  %v1571_v36 = vpop.f32.mrf.mxu1 }
 0x20d   : > { %v1089_v11 = vadd.f32 %v1088_v17, %v980_v32 }
 0x20e   : > { %v985_v40 = vpop.f32.mrf.mxu0  ;;  %v1106_v6 = vpop.f32.mrf.mxu1 }
 0x20f   : > { %v986_v43 = vadd.f32 %v985_v40, %v863_v39  ;;  %v1909_v44 = vadd.f32 %v1905_v3, %v1089_v11 }
 0x210   : > { %v1543_v10 = vpop.f32.mrf.mxu0  ;;  %v1574_v34 = vpop.f32.mrf.mxu1 }
 0x211   : > { %v1095_v47 = vadd.f32 %v1094_v23, %v986_v43  ;;  %v1142_v48 = vsel %vm389_vm5, %v1909_v44, 0.0 }
 0x212   : > { %v1112_v52 = vpop.f32.mrf.mxu1  ;;  %1143 = vadd.xlane.f32.xlu0 %v1142_v48  ;;  %v991_v53 = vpop.f32.mrf.mxu0 }
 0x213   : > { %v992_v55 = vadd.f32 %v991_v53, %v871_v51  ;;  %v1916_v31 = vadd.f32 %v1905_v3, %v1095_v47 }
 0x214   : > { %v1546_v37 = vpop.f32.mrf.mxu0  ;;  %v1577_v56 = vpop.f32.mrf.mxu1 }
 0x215   : > { %v1101_v59 = vadd.f32 %v1100_v28, %v992_v55  ;;  %v1145_v60 = vsel %vm389_vm5, %v1916_v31, 0.0 }
 0x216   : > { %v1118_v63 = vpop.f32.mrf.mxu1  ;;  %1146 = vadd.xlane.f32.xlu0 %v1145_v60  ;;  %v997_v54 = vpop.f32.mrf.mxu0 }
 0x217   : > { %v998_v1 = vadd.f32 %v997_v54, %v879_v61  ;;  %v1923_v35 = vadd.f32 %v1905_v3, %v1101_v59 }
 0x218   : > { %v1549_v41 = vpop.f32.mrf.mxu0  ;;  %v1580_v4 = vpop.f32.mrf.mxu1 }
 0x219   : > { %v1107_v14 = vadd.f32 %v1106_v6, %v998_v1  ;;  %v1148_v12 = vsel %vm389_vm5, %v1923_v35, 0.0 }
 0x21a   : > { %v1124_v58 = vpop.f32.mrf.mxu1  ;;  %1149 = vadd.xlane.f32.xlu0 %v1148_v12  ;;  %v1003_v17 = vpop.f32.mrf.mxu0 }
 0x21b   : > { %v1004_v38 = vadd.f32 %v1003_v17, %v887_v15  ;;  %v1138_v45 = vadd.f32 %v1905_v3, %v1107_v14 }
 0x21c   : > { %v1552_v19 = vpop.f32.mrf.mxu0  ;;  %v1583_v20 = vpop.f32.mrf.mxu1 }
 0x21d   : > { %v1113_v23 = vadd.f32 %v1112_v52, %v1004_v38  ;;  %v1151_v16 = vsel %vm389_vm5, %v1138_v45, 0.0 }
 0x21e   : > { %1152 = vadd.xlane.f32.xlu0 %v1151_v16  ;;  %v1009_v25 = vpop.f32.mrf.mxu0 }
 0x21f   : > { %v1010_v62 = vadd.f32 %v1009_v25, %v895_v24  ;;  %v1139_v26 = vadd.f32 %v1905_v3, %v1113_v23 }
 0x220   : > { %v1555_v27 = vpop.f32.mrf.mxu0 }
 0x221   : > { %v1119_v5 = vadd.f32 %v1118_v63, %v1010_v62  ;;  %v1154_v42 = vsel %vm389_vm5, %v1139_v26, 0.0 }
 0x222   : > { %1155 = vadd.xlane.f32.xlu0 %v1154_v42  ;;  %v1015_v7 = vpop.f32.mrf.mxu0 }
 0x223   : > { %v1016_v28 = vadd.f32 %v1015_v7, %v903_v49  ;;  %v1140_v22 = vadd.f32 %v1905_v3, %v1119_v5 }
 0x224   : > { %v1558_v29 = vpop.f32.mrf.mxu0 }
 0x225   : > { %v1125_v32 = vadd.f32 %v1124_v58, %v1016_v28  ;;  %v1157_v2 = vsel %vm389_vm5, %v1140_v22, 0.0 }
 0x226   : > { %1158 = vadd.xlane.f32.xlu1 %v1157_v2 }
 0x227   : > { %v1141_v33 = vadd.f32 %v1905_v3, %v1125_v32 }
 0x229   : > { %v1161_v36 = vsel %vm1160_vm7, %v1141_v33, 0.0 }
 0x22a   : > { %1162 = vadd.xlane.f32.xlu0 %v1161_v36 }
 0x29b   : > { %v1144_v8 = vpop.xlane.xlu0 %1143 }
 0x29f   : > { %v1147_v11 = vpop.xlane.xlu0 %1146 }
 0x2a0   : > { %v1164_v40 = vadd.f32 %v1147_v11, %v1144_v8  ;;  %v1237_v11 = vld [vmem:[%s2010_s4] sm:$0xff] }
 0x2a3   : > { %v1150_v39 = vpop.xlane.xlu0 %1149 }
 0x2a4   : > { %v1165_v6 = vadd.f32 %v1164_v40, %v1150_v39  ;;  %v1251_v40 = vld [vmem:[%s2011_s5] sm:$0xff] }
 0x2a7   : > { %v1153_v13 = vpop.xlane.xlu0 %1152 }
 0x2a8   : > { %v1166_v43 = vadd.f32 %v1165_v6, %v1153_v13  ;;  %v1238_v6 = vld [vmem:[%s2010_s4 + $0x8] sm:$0xff] }
 0x2ab   : > { %v1156_v30 = vpop.xlane.xlu0 %1155 }
 0x2ac   : > { %v1167_v34 = vadd.f32 %v1166_v43, %v1156_v30 }
 0x2af   : > { %v1159_v10 = vpop.xlane.xlu1 %1158 }
 0x2b0   : > { %v1168_v46 = vadd.f32 %v1167_v34, %v1159_v10 }
 0x2b3   : > { %v1163_v47 = vpop.xlane.xlu0 %1162 }
 0x2b4   : > { %v1170_v48 = vsel %vm1169_vm8, %v1163_v47, 0.0  ;;  %v1239_v47 = vld [vmem:[%s2010_s4 + $0x10] sm:$0xff] }
 0x2b5   : > { %v1171_v51 = vadd.f32 %v1170_v48, %v1168_v46  ;;  %v1252_v46 = vld [vmem:[%s2011_s5 + $0x8] sm:$0xff] }
 0x2b7   : > { %v1172_v3 = vrot.slane %v1171_v51, 4 }
 0x2b9   : > { %v1173_v52 = vadd.f32 %v1172_v3, %v1171_v51 }
 0x2bb   : > { %v1174_v53 = vrot.slane %v1173_v52, 2 }
 0x2bd   : > { %v1175_v50 = vadd.f32 %v1174_v53, %v1173_v52  ;;  %v1253_v52 = vld [vmem:[%s2011_s5 + $0x10] sm:$0xff]  ;;  %v1240_v53 = vld [vmem:[%s2010_s4 + $0x18] sm:$0xff] }
 0x2bf   : > { %v1176_v55 = vrot.slane %v1175_v50, 1 }
 0x2c1   : > { %v1177_v37 = vadd.f32 %v1176_v55, %v1175_v50 }
 0x2c3   : > { %v1178_v56 = vmul.f32 0.0012755102, %v1177_v37 }
 0x2c5   : > { %v1179_v57 = vsub.f32 %v1909_v44, %v1178_v56  ;;  %v1180_v59 = vsub.f32 %v1916_v31, %v1178_v56  ;;  %v1181_v54 = vsub.f32 %v1923_v35, %v1178_v56  ;;  %v1182_v41 = vsub.f32 %v1138_v45, %v1178_v56 }
 0x2c6   : > { %v1183_v14 = vsub.f32 %v1139_v26, %v1178_v56  ;;  %v1184_v12 = vsub.f32 %v1140_v22, %v1178_v56  ;;  %v1949_v35 = vsub.f32 %v1141_v33, %v1178_v56  ;;  %v1254_v56 = vld [vmem:[%s2011_s5 + $0x18] sm:$0xff] }
 0x2c7   : > { %v1186_v60 = vmul.f32 %v1179_v57, %v1179_v57  ;;  %v1187_v63 = vmul.f32 %v1180_v59, %v1180_v59  ;;  %v1188_v1 = vmul.f32 %v1181_v54, %v1181_v54  ;;  %v1189_v9 = vmul.f32 %v1182_v41, %v1182_v41 }
 0x2c8   : > { %v1190_v31 = vmul.f32 %v1183_v14, %v1183_v14  ;;  %v1191_v58 = vmul.f32 %v1184_v12, %v1184_v12  ;;  %v1192_v18 = vmul.f32 %v1949_v35, %v1949_v35 }
 0x2c9   : > { %v1193_v61 = vsel %vm389_vm5, %v1186_v60, 0.0  ;;  %v1196_v0 = vsel %vm389_vm5, %v1187_v63, 0.0  ;;  %v1199_v4 = vsel %vm389_vm5, %v1188_v1, 0.0  ;;  %v1202_v44 = vsel %vm389_vm5, %v1189_v9, 0.0  ;;  %v1255_v63 = vld [vmem:[%s2011_s5 + $0x20] sm:$0xff] }
 0x2ca   : > { %1194 = vadd.xlane.f32.xlu0 %v1193_v61  ;;  %v1205_v15 = vsel %vm389_vm5, %v1190_v31, 0.0  ;;  %v1208_v17 = vsel %vm389_vm5, %v1191_v58, 0.0  ;;  %v1211_v38 = vsel %vm1160_vm7, %v1192_v18, 0.0  ;;  %v1243_v9 = vld [vmem:[%s2010_s4 + $0x30] sm:$0x1] }
 0x2cb   : > { %v1257_v31 = vld [vmem:[%s2011_s5 + $0x30] sm:$0x1] }
 0x2ce   : > { %1197 = vadd.xlane.f32.xlu0 %v1196_v0 }
 0x2d2   : > { %1200 = vadd.xlane.f32.xlu0 %v1199_v4  ;;  %v1256_v4 = vld [vmem:[%s2011_s5 + $0x28] sm:$0xff] }
 0x2d6   : > { %1203 = vadd.xlane.f32.xlu0 %v1202_v44 }
 0x2da   : > { %1206 = vadd.xlane.f32.xlu0 %v1205_v15 }
 0x2de   : > { %1209 = vadd.xlane.f32.xlu0 %v1208_v17 }
 0x2e2   : > { %1212 = vadd.xlane.f32.xlu0 %v1211_v38 }
 0x353   : > { %v1195_v45 = vpop.xlane.xlu0 %1194 }
 0x357   : > { %v1198_v19 = vpop.xlane.xlu0 %1197 }
 0x358   : > { %v1214_v23 = vadd.f32 %v1198_v19, %v1195_v45 }
 0x35b   : > { %v1201_v20 = vpop.xlane.xlu0 %1200 }
 0x35c   : > { %v1215_v24 = vadd.f32 %v1214_v23, %v1201_v20 }
 0x35f   : > { %v1204_v21 = vpop.xlane.xlu0 %1203 }
 0x360   : > { %v1216_v25 = vadd.f32 %v1215_v24, %v1204_v21 }
 0x363   : > { %v1207_v16 = vpop.xlane.xlu0 %1206 }
 0x364   : > { %v1217_v26 = vadd.f32 %v1216_v25, %v1207_v16 }
 0x367   : > { %v1210_v62 = vpop.xlane.xlu0 %1209 }
 0x368   : > { %v1218_v27 = vadd.f32 %v1217_v26, %v1210_v62 }
 0x36b   : > { %v1213_v5 = vpop.xlane.xlu0 %1212 }
 0x36c   : > { %v1219_v42 = vsel %vm1169_vm8, %v1213_v5, 0.0 }
 0x36d   : > { %v1220_v49 = vadd.f32 %v1219_v42, %v1218_v27 }
 0x36f   : > { %v1221_v7 = vrot.slane %v1220_v49, 4 }
 0x371   : > { %v1222_v28 = vadd.f32 %v1221_v7, %v1220_v49 }
 0x373   : > { %v1223_v22 = vrot.slane %v1222_v28, 2 }
 0x375   : > { %v1224_v29 = vadd.f32 %v1223_v22, %v1222_v28 }
 0x377   : > { %v1225_v32 = vrot.slane %v1224_v29, 1 }
 0x379   : > { %v1226_v2 = vadd.f32 %v1225_v32, %v1224_v29 }
 0x37b   : > { %v1227_v33 = vmul.f32 0.0012755102, %v1226_v2 }
 0x37d   : > { %v1228_v36 = vadd.f32 1e-05, %v1227_v33 }
 0x37f   : > { %1595 = vrsqrt.f32 %v1228_v36 }
 0x38c   : > { %v1596_v8 = vpop.eup %1595 }
 0x38d   : > { %v1230_v39 = vmul.f32 %v1596_v8, %v1179_v57  ;;  %v1231_v13 = vmul.f32 %v1596_v8, %v1180_v59  ;;  %v1232_v34 = vmul.f32 %v1596_v8, %v1181_v54  ;;  %v1233_v3 = vmul.f32 %v1596_v8, %v1182_v41  ;;  %v1241_v57 = vld [vmem:[%s2010_s4 + $0x20] sm:$0xff]  ;;  %v1242_v54 = vld [vmem:[%s2010_s4 + $0x28] sm:$0xff] }
 0x38e   : > { %v1234_v37 = vmul.f32 %v1596_v8, %v1183_v14  ;;  %v1235_v61 = vmul.f32 %v1596_v8, %v1184_v12  ;;  %v1236_v41 = vmul.f32 %v1596_v8, %v1949_v35 }
 0x38f   : > { %v1244_v30 = vmul.f32 %v1237_v11, %v1230_v39  ;;  %v1245_v10 = vmul.f32 %v1238_v6, %v1231_v13  ;;  %v1246_v51 = vmul.f32 %v1239_v47, %v1232_v34  ;;  %v1247_v55 = vmul.f32 %v1240_v53, %v1233_v3 }
 0x390   : > { %v1248_v60 = vmul.f32 %v1241_v57, %v1234_v37  ;;  %v1249_v1 = vmul.f32 %v1242_v54, %v1235_v61  ;;  %v1250_v44 = vmul.f32 %v1243_v9, %v1236_v41 }
 0x391   : > { %v1258_v43 = vadd.f32 %v1251_v40, %v1244_v30  ;;  %v1259_v48 = vadd.f32 %v1252_v46, %v1245_v10  ;;  %v1260_v50 = vadd.f32 %v1253_v52, %v1246_v51  ;;  %v1261_v59 = vadd.f32 %v1254_v56, %v1247_v55 }
 0x392   : > { %v1262_v0 = vadd.f32 %v1255_v63, %v1248_v60  ;;  %v1263_v14 = vadd.f32 %v1256_v4, %v1249_v1  ;;  %v1264_v12 = vadd.f32 %v1257_v31, %v1250_v44 }
 0x393   : > { %1265 = vxpose.xlu0.b32.start [1/7] (short) (narrow) %v1258_v43, 16 }
 0x397   : > { %1266 = vxpose.xlu0.b32.cont [2/7] (short) (narrow) %v1259_v48, 16 }
 0x39b   : > { %1267 = vxpose.xlu0.b32.cont [3/7] (short) (narrow) %v1260_v50, 16 }
 0x39f   : > { %1268 = vxpose.xlu0.b32.cont [4/7] (short) (narrow) %v1261_v59, 16 }
 0x3a3   : > { %1269 = vxpose.xlu0.b32.cont [5/7] (short) (narrow) %v1262_v0, 16 }
 0x3a7   : > { %1270 = vxpose.xlu0.b32.cont [6/7] (short) (narrow) %v1263_v14, 16 }
 0x3ab   : > { %1271 = vxpose.xlu0.b32.end [7/7] (short) (narrow) %v1264_v12, 16 }
 0x40f   : > { %v1281_v15 = vpop.trf.xlu0 }
 0x410   : > { %1298 = vst.msk [vmem:[%s265_s24] sm:$0xff] %vm1297_vm9, %v1281_v15 }
 0x413   : > { %v1282_v58 = vpop.trf.xlu0 }
 0x414   : > { %1299 = vst.msk [vmem:[%s265_s24 + $0x8] sm:$0xff] %vm1297_vm9, %v1282_v58 }
 0x415 PF: > { %s16_s21 = sadd.s32 1, %s1603_s21  }
 0x416   : > { %p13_p4 = scmp.ge.s32.totalorder %s16_s21, 7  }
 0x418   :  { %15 = sbr.rel (!%p13_p4) target bundleno = 1 (0x1), region = 77 }

</bundles_post_ra>
